<compile_context>
chip_gen: v6e
topology: v6e:2x2x1
jax: 0.10.0
libtpu: 0.0.40
codegen_flags: <defaults>
</compile_context>

<pallas_src>
import jax
import jax.numpy as jnp
from jax.experimental import pallas as pl
from jax.experimental.pallas import tpu as pltpu

INPUT_DIM = 3
HIDDEN = 128
OUT_DIM = 2
OUT_PAD = 8          # fc4 rows padded 2 -> 8 (one sublane group); lane axis = batch
BN_EPS = 1e-5


def _round_up(n, m):
    return ((n + m - 1) // m) * m


def _mlp_kernel(x_ref,
                w1_ref, c1_ref,
                w2_ref, c2_ref,
                w3_ref, c3_ref,
                w4_ref, c4_ref,
                o_ref):
    """Transposed (feature-major) MLP: activations are (features, TB).

    fc1 (K=3) is three broadcast FMAs on the VPU (a K=3 MXU pass would be
    lane/sublane sparse).  fc2/fc3/fc4 are W^T @ h on the MXU with f32
    accumulation.  BatchNorm (eval) + biases are folded into (weight, shift)
    pairs on the host; dropout is identity in eval mode.
    """
    x = x_ref[...].astype(jnp.float32)                     # (INPUT_DIM, TB)
    w1 = w1_ref[...]                                       # (HIDDEN, INPUT_DIM) f32
    h = w1[:, 0:1] * x[0:1, :]                             # (HIDDEN, TB)
    for i in range(1, INPUT_DIM):
        h = h + w1[:, i:i + 1] * x[i:i + 1, :]
    h = jnp.maximum(h + c1_ref[...], 0.0)

    # fc2 + bn2 (folded) + relu      (MXU, f32 accumulation)
    h = jnp.dot(w2_ref[...], h.astype(w2_ref.dtype),
                preferred_element_type=jnp.float32) + c2_ref[...]
    h = jnp.maximum(h, 0.0)

    # fc3 + bn3 (folded) + relu
    h = jnp.dot(w3_ref[...], h.astype(w3_ref.dtype),
                preferred_element_type=jnp.float32) + c3_ref[...]
    h = jnp.maximum(h, 0.0)

    # fc4: (OUT_PAD, HIDDEN) @ (HIDDEN, TB) -> (OUT_PAD, TB).
    # Lane-dense (8, TB) store: 32 B/row of output HBM traffic instead of 512 B.
    out = jnp.dot(w4_ref[...], h.astype(w4_ref.dtype),
                  preferred_element_type=jnp.float32) + c4_ref[...]
    o_ref[...] = out.astype(o_ref.dtype)


def fold_params(p, compute_dtype=jnp.bfloat16):
    """Fold eval-mode BN + bias into transposed per-layer (weight, shift) pairs."""
    def fold(w, b, gamma, beta, mean, var):
        scale = gamma / jnp.sqrt(var + BN_EPS)              # (1, H)
        shift = beta - mean * scale                         # (1, H)
        wt = (w * scale).T.astype(jnp.float32)              # (H, fan_in)
        ct = (b * scale + shift).T.astype(jnp.float32)      # (H, 1)
        return wt, ct

    w1t, c1t = fold(p["w1"], p["b1"], p["g1"], p["be1"], p["m1"], p["v1"])
    w2t, c2t = fold(p["w2"], p["b2"], p["g2"], p["be2"], p["m2"], p["v2"])
    w3t, c3t = fold(p["w3"], p["b3"], p["g3"], p["be3"], p["m3"], p["v3"])

    # fc4 (no BN): transpose and pad output rows 2 -> 8 with zeros.
    w4t = jnp.zeros((OUT_PAD, HIDDEN), jnp.float32).at[:OUT_DIM, :].set(p["w4"].T)
    c4t = jnp.zeros((OUT_PAD, 1), jnp.float32).at[:OUT_DIM, :].set(p["b4"].T)

    # bf16 operands for the MXU matmuls on all generations (v5e/v6e/v7x MXUs are
    # bf16-native; f32 operands decompose into multiple passes).  Accuracy is kept
    # by f32 accumulation and f32 folded biases.  fc1 weights stay f32 (VPU path).
    w2t = w2t.astype(compute_dtype)
    w3t = w3t.astype(compute_dtype)
    w4t = w4t.astype(compute_dtype)
    return (w1t, c1t, w2t, c2t, w3t, c3t, w4t, c4t)


def dynamics_residual_net_2d(x, params, *, compute_dtype=jnp.bfloat16, block_b=2048):
    """x: (B, INPUT_DIM) float32.  Returns (B, OUT_DIM) float32 (eval-mode forward)."""
    assert x.ndim == 2 and x.shape[1] == INPUT_DIM
    B = x.shape[0]
    folded = fold_params(params, compute_dtype)

    # Batch lives on the lane axis -> tiles are multiples of 128.  Cap the tile so
    # the batch grid has >= 2 steps whenever B > 128 (lets the "parallel" axis
    # shard across both TensorCores on v7x); default 2048 sits comfortably inside
    # the scoped-VMEM budget on every generation.
    tb = max(128, min(_round_up(block_b, 128),
                      _round_up(B, 128),
                      _round_up((B + 1) // 2, 128)))
    bp = _round_up(B, tb)
    grid = (bp // tb,)

    # Transposed, zero-padded input (INPUT_DIM, bp): three contiguous lane-dense
    # DMA rows per tile instead of a (tb, 3) block (42x VMEM inflation, tiny
    # strided DMA descriptors).
    xt = jnp.zeros((INPUT_DIM, bp), jnp.float32).at[:, :B].set(
        x.astype(jnp.float32).T)

    def resident(a):
        # Constant block index -> fetched into VMEM once, stays resident.
        return pl.BlockSpec(a.shape, lambda i: (0,) * a.ndim)

    in_specs = ([pl.BlockSpec((INPUT_DIM, tb), lambda i: (0, i))]
                + [resident(a) for a in folded])
    out_specs = pl.BlockSpec((OUT_PAD, tb), lambda i: (0, i))

    flops = 2 * bp * (INPUT_DIM * HIDDEN + 2 * HIDDEN * HIDDEN + HIDDEN * OUT_PAD)
    bytes_accessed = (int(xt.size) * 4
                      + OUT_PAD * bp * 4
                      + sum(int(a.size) * a.dtype.itemsize for a in folded))

    out_t = pl.pallas_call(
        _mlp_kernel,
        out_shape=jax.ShapeDtypeStruct((OUT_PAD, bp), jnp.float32),
        grid=grid,
        in_specs=in_specs,
        out_specs=out_specs,
        compiler_params=pltpu.CompilerParams(
            dimension_semantics=("parallel",),
            # Explicit budget with headroom under v7x's 64 MiB physical VMEM
            # (fine on v5e/v6e's 128 MiB); leaves room for block_b sweeps to ~4K.
            vmem_limit_bytes=48 * 1024 * 1024),
        cost_estimate=pl.CostEstimate(flops=flops, transcendentals=0,
                                      bytes_accessed=bytes_accessed),
    )(xt, *folded)

    # Slice off the padded output rows (2 real of 8) and padded batch columns.
    return out_t[:OUT_DIM, :B].T


def init_params(key):
    """Deterministic synthetic parameters matching the PyTorch module shapes."""
    ks = jax.random.split(key, 20)

    def lin(kw, kb, fan_in, fan_out):
        bound = 1.0 / jnp.sqrt(jnp.float32(fan_in))
        w = jax.random.uniform(kw, (fan_in, fan_out), jnp.float32, -bound, bound)
        b = jax.random.uniform(kb, (1, fan_out), jnp.float32, -bound, bound)
        return w, b

    w1, b1 = lin(ks[0], ks[1], INPUT_DIM, HIDDEN)
    w2, b2 = lin(ks[2], ks[3], HIDDEN, HIDDEN)
    w3, b3 = lin(ks[4], ks[5], HIDDEN, HIDDEN)
    w4, b4 = lin(ks[6], ks[7], HIDDEN, OUT_DIM)

    # Non-trivial eval-mode BN stats so host-side folding is exercised.
    def bn(kg, kb_, km, kv):
        gamma = jax.random.uniform(kg, (1, HIDDEN), jnp.float32, 0.5, 1.5)
        beta = 0.1 * jax.random.normal(kb_, (1, HIDDEN), jnp.float32)
        mean = 0.1 * jax.random.normal(km, (1, HIDDEN), jnp.float32)
        var = jax.random.uniform(kv, (1, HIDDEN), jnp.float32, 0.5, 1.5)
        return gamma, beta, mean, var

    g1, be1, m1, v1 = bn(ks[8], ks[9], ks[10], ks[11])
    g2, be2, m2, v2 = bn(ks[12], ks[13], ks[14], ks[15])
    g3, be3, m3, v3 = bn(ks[16], ks[17], ks[18], ks[19])

    return dict(w1=w1, b1=b1, g1=g1, be1=be1, m1=m1, v1=v1,
                w2=w2, b2=b2, g2=g2, be2=be2, m2=m2, v2=v2,
                w3=w3, b3=b3, g3=g3, be3=be3, m3=m3, v3=v3,
                w4=w4, b4=b4)


def reference_forward(x, p):
    """Pure-JAX reference with explicit eval-mode BatchNorm (PyTorch semantics)."""
    def bn(h, g, be, m, v):
        return (h - m) / jnp.sqrt(v + BN_EPS) * g + be

    h = jnp.maximum(bn(x @ p["w1"] + p["b1"], p["g1"], p["be1"], p["m1"], p["v1"]), 0.0)
    h = jnp.maximum(bn(h @ p["w2"] + p["b2"], p["g2"], p["be2"], p["m2"], p["v2"]), 0.0)
    h = jnp.maximum(bn(h @ p["w3"] + p["b3"], p["g3"], p["be3"], p["m3"], p["v3"]), 0.0)
    return h @ p["w4"] + p["b4"]


if __name__ == "__main__":
    key = jax.random.PRNGKey(0)
    k_param, k_x1, k_x2 = jax.random.split(key, 3)
    params = init_params(k_param)

    # Small batch (single 128-wide tile after padding) and a multi-tile batch
    # (grid = 2 -> exercises the parallel batch axis / v7x TC sharding path).
    x_small = jax.random.normal(k_x1, (8, INPUT_DIM), jnp.float32)
    x_multi = jax.random.normal(k_x2, (200, INPUT_DIM), jnp.float32)

    ref_small = reference_forward(x_small, params)
    ref_multi = reference_forward(x_multi, params)

    # f32 MXU operands, tight tolerance.
    out = jax.block_until_ready(
        dynamics_residual_net_2d(x_small, params, compute_dtype=jnp.float32))
    assert out.shape == (8, OUT_DIM)
    assert jnp.allclose(out, ref_small, atol=1e-4, rtol=1e-4), "f32 mismatch (small)"

    # Multi-tile (grid >= 2) with f32 operands.
    out_multi = jax.block_until_ready(
        dynamics_residual_net_2d(x_multi, params, compute_dtype=jnp.float32,
                                 block_b=128))
    assert out_multi.shape == (200, OUT_DIM)
    assert jnp.allclose(out_multi, ref_multi, atol=1e-4, rtol=1e-4), \
        "f32 mismatch (multi-tile)"

    # Default path: bf16 MXU operands (recommended on v5e/v6e/v7x), f32 accumulation.
    out_bf16 = jax.block_until_ready(dynamics_residual_net_2d(x_small, params))
    assert out_bf16.shape == (8, OUT_DIM)
    assert jnp.allclose(out_bf16, ref_small, atol=2e-2, rtol=2e-2), "bf16 mismatch"

    # TODO(synk): training-mode batch-statistics BatchNorm and stochastic dropout
    # are not implemented; eval-mode (running stats, dropout=identity) is used.
    print("KERNEL_OK")
</pallas_src>

<mosaic_0001>
module attributes {stable_mosaic.version = 11 : i64} {
  func.func @_mlp_kernel(%arg0: i32, %arg1: memref<3x128xf32, #tpu.memory_space<vmem>>, %arg2: memref<128x3xf32, #tpu.memory_space<vmem>>, %arg3: memref<128x1xf32, #tpu.memory_space<vmem>>, %arg4: memref<128x128xf32, #tpu.memory_space<vmem>>, %arg5: memref<128x1xf32, #tpu.memory_space<vmem>>, %arg6: memref<128x128xf32, #tpu.memory_space<vmem>>, %arg7: memref<128x1xf32, #tpu.memory_space<vmem>>, %arg8: memref<8x128xf32, #tpu.memory_space<vmem>>, %arg9: memref<8x1xf32, #tpu.memory_space<vmem>>, %arg10: memref<8x128xf32, #tpu.memory_space<vmem>>) attributes {dimension_semantics = [#tpu.dimension_semantics<parallel>], iteration_bounds = array<i64: 1>, scalar_prefetch = 0 : i64, scratch_operands = 0 : i64, tpu.core_type = #tpu.core_type<tc>, window_params = [{transform_indices = @transform_0, window_bounds = array<i64: 3, 128>}, {pipeline_mode = #tpu.pipeline_mode<synchronous>, transform_indices = @transform_1, window_bounds = array<i64: 128, 3>}, {pipeline_mode = #tpu.pipeline_mode<synchronous>, transform_indices = @transform_2, window_bounds = array<i64: 128, 1>}, {pipeline_mode = #tpu.pipeline_mode<synchronous>, transform_indices = @transform_3, window_bounds = array<i64: 128, 128>}, {pipeline_mode = #tpu.pipeline_mode<synchronous>, transform_indices = @transform_4, window_bounds = array<i64: 128, 1>}, {pipeline_mode = #tpu.pipeline_mode<synchronous>, transform_indices = @transform_5, window_bounds = array<i64: 128, 128>}, {pipeline_mode = #tpu.pipeline_mode<synchronous>, transform_indices = @transform_6, window_bounds = array<i64: 128, 1>}, {pipeline_mode = #tpu.pipeline_mode<synchronous>, transform_indices = @transform_7, window_bounds = array<i64: 8, 128>}, {pipeline_mode = #tpu.pipeline_mode<synchronous>, transform_indices = @transform_8, window_bounds = array<i64: 8, 1>}, {transform_indices = @transform_9, window_bounds = array<i64: 8, 128>}]} {
    %c0 = arith.constant 0 : index
    %c0_0 = arith.constant 0 : index
    %0 = vector.load %arg1[%c0, %c0_0] : memref<3x128xf32, #tpu.memory_space<vmem>>, vector<3x128xf32>
    %c0_1 = arith.constant 0 : index
    %c0_2 = arith.constant 0 : index
    %1 = vector.load %arg2[%c0_1, %c0_2] : memref<128x3xf32, #tpu.memory_space<vmem>>, vector<128x3xf32>
    %2 = vector.extract_strided_slice %1 {offsets = [0, 0], sizes = [128, 1], strides = [1, 1]} : vector<128x3xf32> to vector<128x1xf32>
    %3 = vector.extract_strided_slice %0 {offsets = [0, 0], sizes = [1, 128], strides = [1, 1]} : vector<3x128xf32> to vector<1x128xf32>
    %4 = vector.broadcast %2 : vector<128x1xf32> to vector<128x128xf32>
    %5 = vector.broadcast %3 : vector<1x128xf32> to vector<128x128xf32>
    %6 = arith.mulf %4, %5 : vector<128x128xf32>
    %7 = vector.extract_strided_slice %1 {offsets = [0, 1], sizes = [128, 1], strides = [1, 1]} : vector<128x3xf32> to vector<128x1xf32>
    %8 = vector.extract_strided_slice %0 {offsets = [1, 0], sizes = [1, 128], strides = [1, 1]} : vector<3x128xf32> to vector<1x128xf32>
    %9 = vector.broadcast %7 : vector<128x1xf32> to vector<128x128xf32>
    %10 = vector.broadcast %8 : vector<1x128xf32> to vector<128x128xf32>
    %11 = arith.mulf %9, %10 : vector<128x128xf32>
    %12 = arith.addf %6, %11 : vector<128x128xf32>
    %13 = vector.extract_strided_slice %1 {offsets = [0, 2], sizes = [128, 1], strides = [1, 1]} : vector<128x3xf32> to vector<128x1xf32>
    %14 = vector.extract_strided_slice %0 {offsets = [2, 0], sizes = [1, 128], strides = [1, 1]} : vector<3x128xf32> to vector<1x128xf32>
    %15 = vector.broadcast %13 : vector<128x1xf32> to vector<128x128xf32>
    %16 = vector.broadcast %14 : vector<1x128xf32> to vector<128x128xf32>
    %17 = arith.mulf %15, %16 : vector<128x128xf32>
    %18 = arith.addf %12, %17 : vector<128x128xf32>
    %c0_3 = arith.constant 0 : index
    %c0_4 = arith.constant 0 : index
    %19 = vector.load %arg3[%c0_3, %c0_4] : memref<128x1xf32, #tpu.memory_space<vmem>>, vector<128x1xf32>
    %20 = vector.broadcast %19 : vector<128x1xf32> to vector<128x128xf32>
    %21 = arith.addf %18, %20 : vector<128x128xf32>
    %cst = arith.constant 0.000000e+00 : f32
    %22 = vector.broadcast %cst : f32 to vector<128x128xf32>
    %23 = arith.maximumf %21, %22 : vector<128x128xf32>
    %c0_5 = arith.constant 0 : index
    %c0_6 = arith.constant 0 : index
    %24 = vector.load %arg4[%c0_5, %c0_6] : memref<128x128xf32, #tpu.memory_space<vmem>>, vector<128x128xf32>
    %cst_7 = arith.constant dense<0.000000e+00> : vector<128x128xf32>
    %25 = tpu.matmul %24, %23, %cst_7 {dimension_numbers = #tpu.dot_dimension_numbers<[1], [0], [0], [1], [0, 0, 1, 1], [], []>} : vector<128x128xf32>, vector<128x128xf32>, vector<128x128xf32> -> vector<128x128xf32>
    %c0_8 = arith.constant 0 : index
    %c0_9 = arith.constant 0 : index
    %26 = vector.load %arg5[%c0_8, %c0_9] : memref<128x1xf32, #tpu.memory_space<vmem>>, vector<128x1xf32>
    %27 = vector.broadcast %26 : vector<128x1xf32> to vector<128x128xf32>
    %28 = arith.addf %25, %27 : vector<128x128xf32>
    %cst_10 = arith.constant 0.000000e+00 : f32
    %29 = vector.broadcast %cst_10 : f32 to vector<128x128xf32>
    %30 = arith.maximumf %28, %29 : vector<128x128xf32>
    %c0_11 = arith.constant 0 : index
    %c0_12 = arith.constant 0 : index
    %31 = vector.load %arg6[%c0_11, %c0_12] : memref<128x128xf32, #tpu.memory_space<vmem>>, vector<128x128xf32>
    %cst_13 = arith.constant dense<0.000000e+00> : vector<128x128xf32>
    %32 = tpu.matmul %31, %30, %cst_13 {dimension_numbers = #tpu.dot_dimension_numbers<[1], [0], [0], [1], [0, 0, 1, 1], [], []>} : vector<128x128xf32>, vector<128x128xf32>, vector<128x128xf32> -> vector<128x128xf32>
    %c0_14 = arith.constant 0 : index
    %c0_15 = arith.constant 0 : index
    %33 = vector.load %arg7[%c0_14, %c0_15] : memref<128x1xf32, #tpu.memory_space<vmem>>, vector<128x1xf32>
    %34 = vector.broadcast %33 : vector<128x1xf32> to vector<128x128xf32>
    %35 = arith.addf %32, %34 : vector<128x128xf32>
    %cst_16 = arith.constant 0.000000e+00 : f32
    %36 = vector.broadcast %cst_16 : f32 to vector<128x128xf32>
    %37 = arith.maximumf %35, %36 : vector<128x128xf32>
    %c0_17 = arith.constant 0 : index
    %c0_18 = arith.constant 0 : index
    %38 = vector.load %arg8[%c0_17, %c0_18] : memref<8x128xf32, #tpu.memory_space<vmem>>, vector<8x128xf32>
    %cst_19 = arith.constant dense<0.000000e+00> : vector<8x128xf32>
    %39 = tpu.matmul %38, %37, %cst_19 {dimension_numbers = #tpu.dot_dimension_numbers<[1], [0], [0], [1], [0, 0, 1, 1], [], []>} : vector<8x128xf32>, vector<128x128xf32>, vector<8x128xf32> -> vector<8x128xf32>
    %c0_20 = arith.constant 0 : index
    %c0_21 = arith.constant 0 : index
    %40 = vector.load %arg9[%c0_20, %c0_21] : memref<8x1xf32, #tpu.memory_space<vmem>>, vector<8x1xf32>
    %41 = vector.broadcast %40 : vector<8x1xf32> to vector<8x128xf32>
    %42 = arith.addf %39, %41 : vector<8x128xf32>
    %c0_22 = arith.constant 0 : index
    %c0_23 = arith.constant 0 : index
    %43 = vector.load %arg10[%c0_22, %c0_23] : memref<8x128xf32, #tpu.memory_space<vmem>>, vector<8x128xf32>
    tpu.vector_store %arg10[%c0_22, %c0_23], %42 {strides = array<i32>} : memref<8x128xf32, #tpu.memory_space<vmem>>, vector<8x128xf32>,
    return
  }
  func.func @transform_0(%arg0: i32) -> (i32, i32) {
    %c0_i32 = arith.constant 0 : i32
    %c0_i32_0 = arith.constant 0 : i32
    return %c0_i32, %arg0 : i32, i32
  }
  func.func @transform_1(%arg0: i32) -> (i32, i32) {
    %c0_i32 = arith.constant 0 : i32
    %c0_i32_0 = arith.constant 0 : i32
    %c0_i32_1 = arith.constant 0 : i32
    return %c0_i32, %c0_i32_0 : i32, i32
  }
  func.func @transform_2(%arg0: i32) -> (i32, i32) {
    %c0_i32 = arith.constant 0 : i32
    %c0_i32_0 = arith.constant 0 : i32
    %c0_i32_1 = arith.constant 0 : i32
    return %c0_i32, %c0_i32_0 : i32, i32
  }
  func.func @transform_3(%arg0: i32) -> (i32, i32) {
    %c0_i32 = arith.constant 0 : i32
    %c0_i32_0 = arith.constant 0 : i32
    %c0_i32_1 = arith.constant 0 : i32
    return %c0_i32, %c0_i32_0 : i32, i32
  }
  func.func @transform_4(%arg0: i32) -> (i32, i32) {
    %c0_i32 = arith.constant 0 : i32
    %c0_i32_0 = arith.constant 0 : i32
    %c0_i32_1 = arith.constant 0 : i32
    return %c0_i32, %c0_i32_0 : i32, i32
  }
  func.func @transform_5(%arg0: i32) -> (i32, i32) {
    %c0_i32 = arith.constant 0 : i32
    %c0_i32_0 = arith.constant 0 : i32
    %c0_i32_1 = arith.constant 0 : i32
    return %c0_i32, %c0_i32_0 : i32, i32
  }
  func.func @transform_6(%arg0: i32) -> (i32, i32) {
    %c0_i32 = arith.constant 0 : i32
    %c0_i32_0 = arith.constant 0 : i32
    %c0_i32_1 = arith.constant 0 : i32
    return %c0_i32, %c0_i32_0 : i32, i32
  }
  func.func @transform_7(%arg0: i32) -> (i32, i32) {
    %c0_i32 = arith.constant 0 : i32
    %c0_i32_0 = arith.constant 0 : i32
    %c0_i32_1 = arith.constant 0 : i32
    return %c0_i32, %c0_i32_0 : i32, i32
  }
  func.func @transform_8(%arg0: i32) -> (i32, i32) {
    %c0_i32 = arith.constant 0 : i32
    %c0_i32_0 = arith.constant 0 : i32
    %c0_i32_1 = arith.constant 0 : i32
    return %c0_i32, %c0_i32_0 : i32, i32
  }
  func.func @transform_9(%arg0: i32) -> (i32, i32) {
    %c0_i32 = arith.constant 0 : i32
    %c0_i32_0 = arith.constant 0 : i32
    return %c0_i32, %arg0 : i32, i32
  }
}

</mosaic_0001>

<bundles_post_ra>
// kernel: tpu_custom_call.1
= control target key start
LH: loop header
LB: loop body
LE: loop exit
PB: predicated region body
PF: predicated region fallthrough
CT: control target
= control target key end

     0   :  { %v1412_v2 = vmov 2   ;;  %v1413_v3 = vmov 0   ;;  %v1414_v5 = vmov 1   ;;  %s1974_s0 = inlined_call_operand.vmem [shape: f32[3,128], index: 0, kind: input, shape index: {}]   ;;  %s1975_s1 = inlined_call_operand.vmem [shape: f32[128,3], index: 1, kind: input, shape index: {}]   ;;  %s1976_s2 = inlined_call_operand.vmem [shape: f32[128,1], index: 2, kind: input, shape index: {}]   ;;  %s1977_s3 = inlined_call_operand.vmem [shape: f32[128,128], index: 3, kind: input, shape index: {}]   ;;  %s1978_s4 = inlined_call_operand.vmem [shape: f32[128,1], index: 4, kind: input, shape index: {}]   ;;  %s1979_s5 = inlined_call_operand.vmem [shape: f32[128,128], index: 5, kind: input, shape index: {}]   ;;  %s1980_s6 = inlined_call_operand.vmem [shape: f32[128,1], index: 6, kind: input, shape index: {}]   ;;  %s1981_s7 = inlined_call_operand.vmem [shape: f32[8,128], index: 7, kind: input, shape index: {}]   ;;  %s1982_s8 = inlined_call_operand.vmem [shape: f32[8,1], index: 8, kind: input, shape index: {}]   ;;  %s1983_s9 = inlined_call_operand.hbm [shape: f32[8,128], index: 9, kind: output, shape index: {}]  }
   0x1   :  { %v48_v0 = vld [vmem:[%s1975_s1 + $0x70] sm:$0xff]  ;;  %v47_v1 = vld [vmem:[%s1975_s1 + $0x68] sm:$0xff]  ;;  %1356 = vset.pattern.permute.xlu0 %v1412_v2  ;;  %1350 = vset.pattern.permute.xlu1 %v1413_v3  ;;  %v49_v4 = vld [vmem:[%s1975_s1 + $0x78] sm:$0xff] }
   0x2   :  { %122 = vperm.xlu1 %1350, %v48_v0   ;;  %303 = vperm.xlu0 %1356, %v47_v1   ;;  %v45_v6 = vld [vmem:[%s1975_s1 + $0x58] sm:$0xff]  ;;  %v43_v7 = vld [vmem:[%s1975_s1 + $0x48] sm:$0xff] }
   0x6   :  { %1351 = vset.pattern.permute.xlu1 %v1414_v5  ;;  %1357 = vset.pattern.permute.xlu0 %v1414_v5 }
   0x7   :  { %207 = vperm.xlu1 %1351, %v48_v0   ;;  %211 = vperm.xlu0 %1357, %v49_v4  }
   0xb   :  { %1352 = vset.pattern.permute.xlu1 %v1412_v2  ;;  %195 = vperm.xlu0 %1357, %v45_v6  }
   0xc   :  { %311 = vperm.xlu1 %1352, %v49_v4  }
   0xd   :  { %14 = vsyncpa [#allocation3], 0  ;;  %v1492_v8 = vld [vmem:[%s1975_s1 + $0x38] sm:$0xff]  ;;  %v1498_v9 = vld [vmem:[%s1975_s1 + $0x28] sm:$0xff]  ;;  %v130_v55 = vlaneseq  ;;  %vm1416_vm0 = vmmov 0   ;;  %s1417_s13 = smov [#allocation2]  }
   0xe   :  { %v46_v10 = vld [vmem:[%s1975_s1 + $0x60] sm:$0xff]  ;;  %v1508_v11 = vld [vmem:[%s1975_s1 + $0x18] sm:$0xff]  ;;  %v1515_v12 = vld [vmem:[%s1975_s1 + $0x8] sm:$0xff]  ;;  %s1108_s14 = sshll.u32 %s1417_s13, 4  ;;  %s1109_s14 = int_to_ptr.vmem [resolvable:$true] %s1108_s14 }
   0xf   :  { %187 = vperm.xlu0 %1357, %v43_v7   ;;  %v365_v13 = vld [vmem:[%s1976_s2 + $0x78] sm:$0xff]  ;;  %v364_v14 = vld [vmem:[%s1976_s2 + $0x70] sm:$0xff]  ;;  %v363_v16 = vld [vmem:[%s1976_s2 + $0x68] sm:$0xff]  ;;  %v131_v58 = vshrl.u32 %v130_v55, 7  ;;  %p1395_p1 = scmp.lt.s32.totalorder %s1109_s14, %s1109_s14 }
  0x10   :  { %1353 = vset.pattern.permute.xlu1 %v1414_v5  ;;  %v44_v15 = vld [vmem:[%s1975_s1 + $0x50] sm:$0xff]  ;;  %v42_v17 = vld [vmem:[%s1975_s1 + $0x40] sm:$0xff]  ;;  %v361_v18 = vld [vmem:[%s1976_s2 + $0x58] sm:$0xff] }
  0x11   :  { %203 = vperm.xlu1 %1353, %v47_v1   ;;  %v40_v19 = vld [vmem:[%s1975_s1 + $0x30] sm:$0xff]  ;;  %v359_v20 = vld [vmem:[%s1976_s2 + $0x48] sm:$0xff]  ;;  %v362_v21 = vld [vmem:[%s1976_s2 + $0x60] sm:$0xff]  ;;  %v216_v61 = vsub.s32 1, %v131_v58  ;;  %v132_v63 = vsub.s32 0, %v131_v58 }
  0x12   :  { %v1556_v22 = vld [vmem:[%s1975_s1 + $0x20] sm:$0xff]  ;;  %v357_v23 = vld [vmem:[%s1976_s2 + $0x38] sm:$0xff]  ;;  %v1567_v24 = vld [vmem:[%s1975_s1 + $0x10] sm:$0xff] }
  0x13   :  { %179 = vperm.xlu0 %1357, %v1492_v8   ;;  %v355_v25 = vld [vmem:[%s1976_s2 + $0x28] sm:$0xff]  ;;  %v1578_v26 = vld [vmem:[%s1975_s1] sm:$0xff]  ;;  %v353_v27 = vld [vmem:[%s1976_s2 + $0x18] sm:$0xff] }
  0x14   :  { %v360_v28 = vld [vmem:[%s1976_s2 + $0x50] sm:$0xff]  ;;  %v350_v30 = vld [vmem:[%s1976_s2] sm:$0xff] }
  0x15   :  { %1354 = vset.pattern.permute.xlu1 %v1412_v2  ;;  %v352_v29 = vld [vmem:[%s1976_s2 + $0x10] sm:$0xff]  ;;  %v506_v32 = vld [vmem:[%s1978_s4 + $0x60] sm:$0xff] }
  0x16   :  { %307 = vperm.xlu1 %1354, %v48_v0   ;;  %v508_v31 = vld [vmem:[%s1978_s4 + $0x70] sm:$0xff]  ;;  %v502_v34 = vld [vmem:[%s1978_s4 + $0x40] sm:$0xff]  ;;  %v316_v0 = vsub.s32 2, %v131_v58  ;;  %v509_v58 = vld [vmem:[%s1978_s4 + $0x78] sm:$0xff] }
  0x17   :  { %171 = vperm.xlu0 %1357, %v1498_v9   ;;  %v504_v33 = vld [vmem:[%s1978_s4 + $0x50] sm:$0xff]  ;;  %v358_v36 = vld [vmem:[%s1976_s2 + $0x40] sm:$0xff] }
  0x18   :  { %v500_v35 = vld [vmem:[%s1978_s4 + $0x30] sm:$0xff]  ;;  %v498_v37 = vld [vmem:[%s1978_s4 + $0x20] sm:$0xff] }
  0x19   :  { %v496_v40 = vld [vmem:[%s1978_s4 + $0x10] sm:$0xff]  ;;  %v494_v41 = vld [vmem:[%s1978_s4] sm:$0xff] }
  0x1a   :  { %1355 = vset.pattern.permute.xlu1 %v1414_v5  ;;  %v781_v44 = vld [vmem:[%s1980_s6 + $0x70] sm:$0xff]  ;;  %v779_v47 = vld [vmem:[%s1980_s6 + $0x60] sm:$0xff] }
  0x1b   :  { %199 = vperm.xlu1 %1355, %v46_v10   ;;  %163 = vperm.xlu0 %1357, %v1508_v11   ;;  %v777_v50 = vld [vmem:[%s1980_s6 + $0x50] sm:$0xff]  ;;  %v775_v54 = vld [vmem:[%s1980_s6 + $0x40] sm:$0xff] }
  0x1c   :  { %v356_v52 = vld [vmem:[%s1976_s2 + $0x30] sm:$0xff]  ;;  %v771_v62 = vld [vmem:[%s1980_s6 + $0x20] sm:$0xff] }
  0x1d   :  { %v773_v57 = vld [vmem:[%s1980_s6 + $0x30] sm:$0xff] }
  0x1f   :  { %1358 = vset.pattern.permute.xlu1 %v1413_v3  ;;  %155 = vperm.xlu0 %1357, %v1515_v12  }
  0x20   :  { %443 = vperm.xlu1 %1358, %v365_v13  }
  0x23   :  { %1384 = vset.pattern.permute.xlu0 %v1413_v3 }
  0x24   :  { %107 = vperm.xlu1 %1358, %v45_v6   ;;  %127 = vperm.xlu0 %1384, %v49_v4   ;;  %v33_v4 = vld [vmem:[%s1974_s0] sm:$0x7]  ;;  %s1390_s0 = scalar_lea.vmem %s1109_s14, 128 }
  0x25   :  { %p1391_p0 = scmp.ne.s32.totalorder %s1109_s14, %s1390_s0  ;;  %p1396_p2 = scmp.lt.s32.totalorder %s1390_s0, %s1390_s0 }
  0x27   :  { %p1397_p3 = por %p1396_p2, %p1395_p1 }
  0x28   :  { %1359 = vset.pattern.permute.xlu1 %v1412_v2  ;;  %117 = vperm.xlu0 %1384, %v47_v1  }
  0x29   :  { %299 = vperm.xlu1 %1359, %v46_v10   ;;  %p1398_p4 = pnand %p1397_p3, %p1391_p0 }
  0x2c   :  { %112 = vperm.xlu0 %1384, %v46_v10   ;;  %v1692_v10 = vrot.slane %v33_v4, %v316_v0 }
  0x2d   :  { %1360 = vset.pattern.permute.xlu1 %v1413_v3 }
  0x2e   :  { %438 = vperm.xlu1 %1360, %v364_v14  }
  0x30   :  { %102 = vperm.xlu0 %1384, %v44_v15  }
  0x32   :  { %1361 = vset.pattern.permute.xlu1 %v1414_v5 }
  0x33   :  { %191 = vperm.xlu1 %1361, %v44_v15  }
  0x34   :  { %433 = vperm.xlu0 %1384, %v363_v16  }
  0x37   :  { %1362 = vset.pattern.permute.xlu1 %v1412_v2 }
  0x38   :  { %295 = vperm.xlu1 %1362, %v45_v6   ;;  %92 = vperm.xlu0 %1384, %v42_v17  }
  0x3c   :  { %1363 = vset.pattern.permute.xlu1 %v1413_v3  ;;  %423 = vperm.xlu0 %1384, %v361_v18  }
  0x3d   :  { %97 = vperm.xlu1 %1363, %v43_v7  }
  0x40   :  { %82 = vperm.xlu0 %1384, %v40_v19  }
  0x41   :  { %1364 = vset.pattern.permute.xlu1 %v1412_v2 }
  0x42   :  { %291 = vperm.xlu1 %1364, %v44_v15  }
  0x44   :  { %413 = vperm.xlu0 %1384, %v359_v20  }
  0x46   :  { %1365 = vset.pattern.permute.xlu1 %v1413_v3 }
  0x47   :  { %428 = vperm.xlu1 %1365, %v362_v21  }
  0x48   :  { %72 = vperm.xlu0 %1384, %v1556_v22  }
  0x4b   :  { %1366 = vset.pattern.permute.xlu1 %v1414_v5 }
  0x4c   :  { %183 = vperm.xlu1 %1366, %v42_v17   ;;  %403 = vperm.xlu0 %1384, %v357_v23  }
  0x50   :  { %1367 = vset.pattern.permute.xlu1 %v1412_v2  ;;  %62 = vperm.xlu0 %1384, %v1567_v24  }
  0x51   :  { %287 = vperm.xlu1 %1367, %v43_v7   ;;  %v1684_v7 = vrot.slane %v33_v4, %v216_v61  ;;  %v478_v61 = vld [vmem:[%s1977_s3] sm:$0xff] }
  0x52   :  { %1229 = vmatprep.mubr.f32.mxu0 %v478_v61 }
  0x54   :  { %393 = vperm.xlu0 %1384, %v355_v25  }
  0x55   :  { %1368 = vset.pattern.permute.xlu1 %v1413_v3 }
  0x56   :  { %87 = vperm.xlu1 %1368, %v1492_v8  }
  0x58   :  { %52 = vperm.xlu0 %1384, %v1578_v26  }
  0x5a   :  { %1369 = vset.pattern.permute.xlu1 %v1412_v2 }
  0x5b   :  { %283 = vperm.xlu1 %1369, %v42_v17  }
  0x5c   :  { %383 = vperm.xlu0 %1384, %v353_v27  }
  0x5f   :  { %1370 = vset.pattern.permute.xlu1 %v1413_v3 }
  0x60   :  { %418 = vperm.xlu1 %1370, %v360_v28   ;;  %378 = vperm.xlu0 %1384, %v352_v29  }
  0x64   :  { %1371 = vset.pattern.permute.xlu1 %v1414_v5  ;;  %368 = vperm.xlu0 %1384, %v350_v30  }
  0x65   :  { %175 = vperm.xlu1 %1371, %v40_v19  }
  0x68   :  { %582 = vperm.xlu0 %1384, %v508_v31  }
  0x69   :  { %1372 = vset.pattern.permute.xlu1 %v1412_v2 }
  0x6a   :  { %279 = vperm.xlu1 %1372, %v1492_v8   ;;  %v769_v8 = vld [vmem:[%s1980_s6 + $0x10] sm:$0xff] }
  0x6c   :  { %572 = vperm.xlu0 %1384, %v506_v32  }
  0x6e   :  { %1373 = vset.pattern.permute.xlu1 %v1413_v3 }
  0x6f   :  { %77 = vperm.xlu1 %1373, %v1498_v9  }
  0x70   :  { %562 = vperm.xlu0 %1384, %v504_v33  }
  0x73   :  { %1374 = vset.pattern.permute.xlu1 %v1412_v2 }
  0x74   :  { %275 = vperm.xlu1 %1374, %v40_v19   ;;  %552 = vperm.xlu0 %1384, %v502_v34   ;;  %v354_v34 = vld [vmem:[%s1976_s2 + $0x20] sm:$0xff] }
  0x78   :  { %1375 = vset.pattern.permute.xlu1 %v1413_v3  ;;  %542 = vperm.xlu0 %1384, %v500_v35  }
  0x79   :  { %408 = vperm.xlu1 %1375, %v358_v36  }
  0x7c   :  { %532 = vperm.xlu0 %1384, %v498_v37  }
  0x7d   :  { %v1624_v38 = vpop.permute.xlu1 %122  ;;  %1376 = vset.pattern.permute.xlu1 %v1414_v5  ;;  %v1627_v39 = vpop.permute.xlu0 %303 }
  0x7e   :  { %167 = vperm.xlu1 %1376, %v1556_v22   ;;  %v331_v36 = vmul.f32 %v1692_v10, %v1627_v39 }
  0x80   :  { %522 = vperm.xlu0 %1384, %v496_v40  }
  0x82   :  { %v208_v42 = vpop.permute.xlu1 %207  ;;  %1377 = vset.pattern.permute.xlu1 %v1412_v2  ;;  %v212_v43 = vpop.permute.xlu0 %211 }
  0x83   :  { %271 = vperm.xlu1 %1377, %v1498_v9   ;;  %v1690_v9 = vrot.slane %v33_v4, %v132_v63  ;;  %v233_v13 = vmul.f32 %v1684_v7, %v212_v43  ;;  %v232_v17 = vmul.f32 %v1684_v7, %v208_v42 }
  0x84   :  { %512 = vperm.xlu0 %1384, %v494_v41  }
  0x85   :  { %v148_v21 = vmul.f32 %v1690_v9, %v1624_v38 }
  0x86   :  { %v1641_v45 = vpop.permute.xlu0 %195 }
  0x87   :  { %v312_v46 = vpop.permute.xlu1 %311  ;;  %1378 = vset.pattern.permute.xlu1 %v1413_v3  ;;  %v248_v27 = vadd.f32 %v232_v17, %v148_v21 }
  0x88   :  { %67 = vperm.xlu1 %1378, %v1508_v11   ;;  %855 = vperm.xlu0 %1384, %v781_v44   ;;  %v333_v18 = vmul.f32 %v1692_v10, %v312_v46 }
  0x8a   :  { %v1648_v48 = vpop.permute.xlu0 %187 }
  0x8c   :  { %v204_v49 = vpop.permute.xlu1 %203  ;;  %1379 = vset.pattern.permute.xlu1 %v1412_v2  ;;  %845 = vperm.xlu0 %1384, %v779_v47  }
  0x8d   :  { %267 = vperm.xlu1 %1379, %v1556_v22   ;;  %v231_v31 = vmul.f32 %v1684_v7, %v204_v49  ;;  %v229_v49 = vmul.f32 %v1684_v7, %v1641_v45 }
  0x8e   :  { %v1655_v51 = vpop.permute.xlu0 %179 }
  0x90   :  { %835 = vperm.xlu0 %1384, %v777_v50  }
  0x91   :  { %v308_v53 = vpop.permute.xlu1 %307  ;;  %1380 = vset.pattern.permute.xlu1 %v1413_v3 }
  0x92   :  { %398 = vperm.xlu1 %1380, %v356_v52   ;;  %v1664_v56 = vpop.permute.xlu0 %171  ;;  %v332_v22 = vmul.f32 %v1692_v10, %v308_v53 }
  0x94   :  { %825 = vperm.xlu0 %1384, %v775_v54   ;;  %v348_v32 = vadd.f32 %v332_v22, %v248_v27 }
  0x96   :  { %v1669_v59 = vpop.permute.xlu1 %199  ;;  %1381 = vset.pattern.permute.xlu1 %v1414_v5  ;;  %v1672_v60 = vpop.permute.xlu0 %163 }
  0x97   :  { %159 = vperm.xlu1 %1381, %v1567_v24   ;;  %v230_v53 = vmul.f32 %v1684_v7, %v1669_v59 }
  0x98   :  { %815 = vperm.xlu0 %1384, %v773_v57  }
  0x9a   :  { %v1678_v1 = vpop.permute.xlu0 %155 }
  0x9b   :  { %v444_v6 = vpop.permute.xlu1 %443  ;;  %1382 = vset.pattern.permute.xlu1 %v1412_v2 }
  0x9c   :  { %263 = vperm.xlu1 %1382, %v1508_v11   ;;  %805 = vperm.xlu0 %1384, %v771_v62   ;;  %v767_v11 = vld [vmem:[%s1980_s6] sm:$0xff] }
  0x9f   :  { %v108_v14 = vpop.permute.xlu1 %107  ;;  %v128_v15 = vpop.permute.xlu0 %127 }
  0xa0   :  { %v149_v16 = vmul.f32 %v1690_v9, %v128_v15  ;;  %1383 = vset.pattern.permute.xlu1 %v1413_v3  ;;  %795 = vperm.xlu0 %1384, %v769_v8   ;;  %v145_v50 = vmul.f32 %v1690_v9, %v108_v14  ;;  %v505_v14 = vld [vmem:[%s1978_s4 + $0x58] sm:$0xff]  ;;  %v503_v15 = vld [vmem:[%s1978_s4 + $0x48] sm:$0xff] }
  0xa1   :  { %57 = vperm.xlu1 %1383, %v1515_v12  }
  0xa2   :  { %v249_v19 = vadd.f32 %v233_v13, %v149_v16  ;;  %v245_v54 = vadd.f32 %v229_v49, %v145_v50  ;;  %v776_v49 = vld [vmem:[%s1980_s6 + $0x48] sm:$0xff] }
  0xa3   :  { %v118_v20 = vpop.permute.xlu0 %117 }
  0xa4   :  { %v300_v23 = vpop.permute.xlu1 %299  ;;  %785 = vperm.xlu0 %1384, %v767_v11   ;;  %v349_v25 = vadd.f32 %v333_v18, %v249_v19  ;;  %v147_v28 = vmul.f32 %v1690_v9, %v118_v20  ;;  %v501_v11 = vld [vmem:[%s1978_s4 + $0x38] sm:$0xff]  ;;  %v227_v18 = vmul.f32 %v1684_v7, %v1648_v48  ;;  %v499_v20 = vld [vmem:[%s1978_s4 + $0x28] sm:$0xff] }
  0xa5   :  { %1385 = vset.pattern.permute.xlu1 %v1412_v2  ;;  %v330_v57 = vmul.f32 %v1692_v10, %v300_v23 }
  0xa6   :  { %259 = vperm.xlu1 %1385, %v1567_v24   ;;  %v461_v29 = vadd.f32 %v444_v6, %v349_v25  ;;  %v247_v37 = vadd.f32 %v231_v31, %v147_v28 }
  0xa7   :  { %v113_v30 = vpop.permute.xlu0 %112 }
  0xa8   :  { %v477_v33 = vmax.f32 %v461_v29, 0.0  ;;  %v347_v42 = vadd.f32 %v331_v36, %v247_v37  ;;  %v497_v29 = vld [vmem:[%s1978_s4 + $0x18] sm:$0xff] }
  0xa9   :  { %v439_v35 = vpop.permute.xlu1 %438 }
  0xaa   :  { %v460_v38 = vadd.f32 %v439_v35, %v348_v32  ;;  %1386 = vset.pattern.permute.xlu1 %v1413_v3  ;;  %1197 = vmatprep.subr.mxu0 %v477_v33  ;;  %v495_v35 = vld [vmem:[%s1978_s4 + $0x8] sm:$0xff] }
  0xab   :  { %v1716_v24 = vpop.permute.xlu0 %102  ;;  %388 = vperm.xlu1 %1386, %v354_v34   ;;  %1198 = vmatpush3.msra.mxu0 %v477_v33 }
  0xac   :  { %v476_v40 = vmax.f32 %v460_v38, 0.0  ;;  %v144_v21 = vmul.f32 %v1690_v9, %v1716_v24  ;;  %v782_v24 = vld [vmem:[%s1980_s6 + $0x78] sm:$0xff] }
  0xae   :  { %v192_v41 = vpop.permute.xlu1 %191  ;;  %1199 = vmatprep.subr.mxu0 %v476_v40 }
  0xaf   :  { %v434_v43 = vpop.permute.xlu0 %433  ;;  %1387 = vset.pattern.permute.xlu1 %v1414_v5  ;;  %1200 = vmatpush3.msra.mxu0 %v476_v40  ;;  %v146_v5 = vmul.f32 %v1690_v9, %v113_v30  ;;  %v228_v22 = vmul.f32 %v1684_v7, %v192_v41 }
  0xb0   :  { %v459_v44 = vadd.f32 %v434_v43, %v347_v42  ;;  %151 = vperm.xlu1 %1387, %v1578_v26   ;;  %v780_v42 = vld [vmem:[%s1980_s6 + $0x68] sm:$0xff] }
  0xb1   :  { %v246_v55 = vadd.f32 %v230_v53, %v146_v5  ;;  %v244_v30 = vadd.f32 %v228_v22, %v144_v21 }
  0xb2   :  { %v475_v39 = vmax.f32 %v459_v44, 0.0  ;;  %v778_v44 = vld [vmem:[%s1980_s6 + $0x58] sm:$0xff] }
  0xb3   :  { %v296_v46 = vpop.permute.xlu1 %295  ;;  %v1727_v52 = vpop.permute.xlu0 %92  ;;  %v346_v62 = vadd.f32 %v330_v57, %v246_v55 }
  0xb4   :  { %1388 = vset.pattern.permute.xlu1 %v1412_v2  ;;  %1201 = vmatprep.subr.mxu0 %v475_v39  ;;  %v329_v2 = vmul.f32 %v1692_v10, %v296_v46  ;;  %v225_v46 = vmul.f32 %v1684_v7, %v1655_v51  ;;  %v142_v50 = vmul.f32 %v1690_v9, %v1727_v52  ;;  %v774_v51 = vld [vmem:[%s1980_s6 + $0x38] sm:$0xff]  ;;  %v772_v52 = vld [vmem:[%s1980_s6 + $0x28] sm:$0xff] }
  0xb5   :  { %255 = vperm.xlu1 %1388, %v1515_v12   ;;  %1202 = vmatpush3.msra.mxu0 %v475_v39  ;;  %v351_v12 = vld [vmem:[%s1976_s2 + $0x8] sm:$0xff] }
  0xb7   :  { %v424_v59 = vpop.permute.xlu0 %423 }
  0xb8   :  { %v98_v47 = vpop.permute.xlu1 %97 }
  0xb9   :  { %251 = vperm.xlu1 %1388, %v1578_v26   ;;  %v345_v26 = vadd.f32 %v329_v2, %v245_v54  ;;  %v143_v19 = vmul.f32 %v1690_v9, %v98_v47 }
  0xbb   :  { %v457_v0 = vadd.f32 %v424_v59, %v345_v26  ;;  %v1765_v25 = vpop.permute.xlu0 %82  ;;  %v243_v27 = vadd.f32 %v227_v18, %v143_v19 }
  0xbd   :  { %v292_v45 = vpop.permute.xlu1 %291  ;;  %1389 = vset.pattern.permute.xlu1 %v1413_v3  ;;  %v507_v3 = vld [vmem:[%s1978_s4 + $0x68] sm:$0xff]  ;;  %v473_v8 = vmax.f32 %v457_v0, 0.0  ;;  %v770_v0 = vld [vmem:[%s1980_s6 + $0x18] sm:$0xff] }
  0xbe   :  { %373 = vperm.xlu1 %1389, %v351_v12   ;;  %v328_v28 = vmul.f32 %v1692_v10, %v292_v45 }
  0xbf   :  { %v414_v33 = vpop.permute.xlu0 %413 }
  0xc0   :  { %v344_v32 = vadd.f32 %v328_v28, %v244_v30 }
  0xc2   :  { %v429_v63 = vpop.permute.xlu1 %428  ;;  %587 = vperm.xlu1 %1389, %v509_v58  }
  0xc3   :  { %v458_v4 = vadd.f32 %v429_v63, %v346_v62  ;;  %v73_v2 = vpop.permute.xlu0 %72 }
  0xc5   :  { %v474_v6 = vmax.f32 %v458_v4, 0.0 }
  0xc6   :  { %577 = vperm.xlu1 %1389, %v507_v3  }
  0xc7   :  { %v184_v13 = vpop.permute.xlu1 %183  ;;  %1203 = vmatprep.subr.mxu0 %v474_v6  ;;  %v404_v58 = vpop.permute.xlu0 %403 }
  0xc8   :  { %1204 = vmatpush3.msra.mxu0 %v474_v6  ;;  %v226_v5 = vmul.f32 %v1684_v7, %v184_v13  ;;  %v768_v6 = vld [vmem:[%s1980_s6 + $0x8] sm:$0xff]  ;;  %v1025_v13 = vld [vmem:[%s1982_s8] sm:$0xff] }
  0xc9   :  { %1205 = vmatprep.subr.mxu0 %v473_v8 }
  0xca   :  { %567 = vperm.xlu1 %1389, %v505_v14   ;;  %1206 = vmatpush3.msra.mxu0 %v473_v8  ;;  %v242_v45 = vadd.f32 %v226_v5, %v142_v50 }
  0xcb   :  { %v63_v19 = vpop.permute.xlu0 %62 }
  0xcc   :  { %v288_v16 = vpop.permute.xlu1 %287 }
  0xcd   :  { %v327_v23 = vmul.f32 %v1692_v10, %v288_v16  ;;  %v223_v16 = vmul.f32 %v1684_v7, %v1664_v56 }
  0xce   :  { %557 = vperm.xlu1 %1389, %v503_v15  }
  0xcf   :  { %v343_v31 = vadd.f32 %v327_v23, %v243_v27 }
  0xd1   :  { %v88_v17 = vpop.permute.xlu1 %87  ;;  %v455_v37 = vadd.f32 %v414_v33, %v343_v31 }
  0xd2   :  { %547 = vperm.xlu1 %1389, %v501_v11   ;;  %v141_v47 = vmul.f32 %v1690_v9, %v88_v17  ;;  %v140_v11 = vmul.f32 %v1690_v9, %v1765_v25 }
  0xd3   :  { %v471_v41 = vmax.f32 %v455_v37, 0.0  ;;  %v221_v37 = vmul.f32 %v1684_v7, %v1672_v60 }
  0xd4   :  { %v241_v12 = vadd.f32 %v225_v46, %v141_v47 }
  0xd6   :  { %v284_v48 = vpop.permute.xlu1 %283  ;;  %537 = vperm.xlu1 %1389, %v499_v20  }
  0xd7   :  { %v326_v54 = vmul.f32 %v1692_v10, %v284_v48  ;;  %v394_v48 = vpop.permute.xlu0 %393 }
  0xd9   :  { %v342_v26 = vadd.f32 %v326_v54, %v242_v45 }
  0xda   :  { %527 = vperm.xlu1 %1389, %v497_v29  }
  0xdb   :  { %v419_v34 = vpop.permute.xlu1 %418 }
  0xdc   :  { %v456_v36 = vadd.f32 %v419_v34, %v344_v32  ;;  %v53_v34 = vpop.permute.xlu0 %52 }
  0xde   :  { %v472_v38 = vmax.f32 %v456_v36, 0.0  ;;  %517 = vperm.xlu1 %1389, %v495_v35  }
  0xe0   :  { %v176_v40 = vpop.permute.xlu1 %175  ;;  %1207 = vmatprep.subr.mxu0 %v472_v38  ;;  %v384_v46 = vpop.permute.xlu0 %383 }
  0xe1   :  { %1208 = vmatpush3.msra.mxu0 %v472_v38  ;;  %v224_v17 = vmul.f32 %v1684_v7, %v176_v40  ;;  %v138_v38 = vmul.f32 %v1690_v9, %v73_v2 }
  0xe2   :  { %860 = vperm.xlu1 %1389, %v782_v24   ;;  %1209 = vmatprep.subr.mxu0 %v471_v41 }
  0xe3   :  { %1210 = vmatpush3.msra.mxu0 %v471_v41  ;;  %v240_v23 = vadd.f32 %v224_v17, %v140_v11 }
  0xe5   :  { %v280_v43 = vpop.permute.xlu1 %279 }
  0xe6   :  { %850 = vperm.xlu1 %1389, %v780_v42   ;;  %v325_v53 = vmul.f32 %v1692_v10, %v280_v43  ;;  %v136_v42 = vmul.f32 %v1690_v9, %v63_v19 }
  0xe8   :  { %v341_v57 = vadd.f32 %v325_v53, %v241_v12 }
  0xea   :  { %v78_v39 = vpop.permute.xlu1 %77  ;;  %840 = vperm.xlu1 %1389, %v778_v44   ;;  %v453_v62 = vadd.f32 %v404_v58, %v341_v57 }
  0xeb   :  { %v139_v15 = vmul.f32 %v1690_v9, %v78_v39 }
  0xec   :  { %v469_v3 = vmax.f32 %v453_v62, 0.0  ;;  %v134_v62 = vmul.f32 %v1690_v9, %v53_v34 }
  0xed   :  { %v239_v20 = vadd.f32 %v223_v16, %v139_v15 }
  0xee   :  { %830 = vperm.xlu1 %1389, %v776_v49  }
  0xef   :  { %v276_v55 = vpop.permute.xlu1 %275 }
  0xf0   :  { %v324_v21 = vmul.f32 %v1692_v10, %v276_v55  ;;  %v379_v55 = vpop.permute.xlu0 %378 }
  0xf2   :  { %820 = vperm.xlu1 %1389, %v774_v51   ;;  %v340_v28 = vadd.f32 %v324_v21, %v240_v23  ;;  %v484_v21 = vld [vmem:[%s1977_s3 + $0x30] sm:$0xff]  ;;  %v486_v23 = vld [vmem:[%s1977_s3 + $0x40] sm:$0xff] }
  0xf4   :  { %v409_v59 = vpop.permute.xlu1 %408  ;;  %v369_v15 = vpop.permute.xlu0 %368 }
  0xf5   :  { %v454_v61 = vadd.f32 %v409_v59, %v342_v26 }
  0xf6   :  { %810 = vperm.xlu1 %1389, %v772_v52  }
  0xf7   :  { %v470_v63 = vmax.f32 %v454_v61, 0.0 }
  0xf9   :  { %v168_v4 = vpop.permute.xlu1 %167  ;;  %1211 = vmatprep.subr.mxu0 %v470_v63 }
  0xfa   :  { %800 = vperm.xlu1 %1389, %v770_v0   ;;  %1212 = vmatpush3.msra.mxu0 %v470_v63  ;;  %v222_v24 = vmul.f32 %v1684_v7, %v168_v4  ;;  %v219_v63 = vmul.f32 %v1684_v7, %v1678_v1  ;;  %v479_v1 = vld [vmem:[%s1977_s3 + $0x8] sm:$0xff] }
  0xfb   :  { %1213 = vmatprep.subr.mxu0 %v469_v3 }
  0xfc   :  { %1214 = vmatpush3.msra.mxu0 %v469_v3  ;;  %v238_v49 = vadd.f32 %v222_v24, %v138_v38 }
  0xfe   :  { %v272_v8 = vpop.permute.xlu1 %271  ;;  %790 = vperm.xlu1 %1389, %v768_v6  }
  0xff   :  { %v323_v18 = vmul.f32 %v1692_v10, %v272_v8 }
 0x101   :  { %v339_v27 = vadd.f32 %v323_v18, %v239_v20  ;;  %v483_v20 = vld [vmem:[%s1977_s3 + $0x28] sm:$0xff] }
 0x102   :  { %1028 = vperm.xlu1 %1389, %v1025_v13  }
 0x103   :  { %v68_v14 = vpop.permute.xlu1 %67  ;;  %v451_v31 = vadd.f32 %v394_v48, %v339_v27  ;;  %v487_v27 = vld [vmem:[%s1977_s3 + $0x48] sm:$0xff]  ;;  %v489_v48 = vld [vmem:[%s1977_s3 + $0x58] sm:$0xff] }
 0x104   :  { %v137_v36 = vmul.f32 %v1690_v9, %v68_v14 }
 0x105   :  { %v467_v25 = vmax.f32 %v451_v31, 0.0  ;;  %v492_v31 = vld [vmem:[%s1977_s3 + $0x70] sm:$0xff] }
 0x106   :  { %v237_v43 = vadd.f32 %v221_v37, %v137_v36 }
 0x108   :  { %v268_v22 = vpop.permute.xlu1 %267 }
 0x109   :  { %v322_v44 = vmul.f32 %v1692_v10, %v268_v22  ;;  %v485_v22 = vld [vmem:[%s1977_s3 + $0x38] sm:$0xff] }
 0x10b   :  { %v338_v53 = vadd.f32 %v322_v44, %v238_v49 }
 0x10d   :  { %v399_v29 = vpop.permute.xlu1 %398 }
 0x10e   :  { %v452_v30 = vadd.f32 %v399_v29, %v340_v28  ;;  %v488_v28 = vld [vmem:[%s1977_s3 + $0x50] sm:$0xff]  ;;  %v490_v29 = vld [vmem:[%s1977_s3 + $0x60] sm:$0xff] }
 0x110   :  { %v468_v56 = vmax.f32 %v452_v30, 0.0  ;;  %v491_v30 = vld [vmem:[%s1977_s3 + $0x68] sm:$0xff] }
 0x112   :  { %v160_v32 = vpop.permute.xlu1 %159  ;;  %1215 = vmatprep.subr.mxu0 %v468_v56 }
 0x113   :  { %1216 = vmatpush3.msra.mxu0 %v468_v56  ;;  %v220_v40 = vmul.f32 %v1684_v7, %v160_v32  ;;  %v493_v56 = vld [vmem:[%s1977_s3 + $0x78] sm:$0xff]  ;;  %v751_v32 = vld [vmem:[%s1979_s5] sm:$0xff] }
 0x114   :  { %1217 = vmatprep.subr.mxu0 %v467_v25  ;;  %1285 = vmatprep.mubr.f32.mxu1 %v751_v32 }
 0x115   :  { %1218 = vmatpush3.msra.mxu0 %v467_v25  ;;  %v236_v50 = vadd.f32 %v220_v40, %v136_v42  ;;  %v583_v40 = vpop.permute.xlu0 %582 }
 0x117   :  { %v264_v33 = vpop.permute.xlu1 %263 }
 0x118   :  { %v321_v41 = vmul.f32 %v1692_v10, %v264_v33 }
 0x11a   :  { %v337_v60 = vadd.f32 %v321_v41, %v237_v43 }
 0x11c   :  { %v58_v35 = vpop.permute.xlu1 %57  ;;  %v449_v54 = vadd.f32 %v384_v46, %v337_v60 }
 0x11d   :  { %v135_v61 = vmul.f32 %v1690_v9, %v58_v35  ;;  %v481_v9 = vld [vmem:[%s1977_s3 + $0x18] sm:$0xff] }
 0x11e   :  { %v465_v26 = vmax.f32 %v449_v54, 0.0 }
 0x11f   :  { %v235_v8 = vadd.f32 %v219_v63, %v135_v61 }
 0x121   :  { %v260_v39 = vpop.permute.xlu1 %259 }
 0x122   :  { %v320_v47 = vmul.f32 %v1692_v10, %v260_v39  ;;  %v573_v39 = vpop.permute.xlu0 %572 }
 0x124   :  { %v336_v5 = vadd.f32 %v320_v47, %v236_v50 }
 0x126   :  { %v389_v2 = vpop.permute.xlu1 %388  ;;  %v448_v45 = vadd.f32 %v379_v55, %v336_v5  ;;  %v563_v60 = vpop.permute.xlu0 %562 }
 0x127   :  { %v450_v12 = vadd.f32 %v389_v2, %v338_v53 }
 0x128   :  { %v464_v52 = vmax.f32 %v448_v45, 0.0 }
 0x129   :  { %v466_v51 = vmax.f32 %v450_v12, 0.0 }
 0x12b   :  { %v152_v57 = vpop.permute.xlu1 %151  ;;  %1219 = vmatprep.subr.mxu0 %v466_v51 }
 0x12c   :  { %1220 = vmatpush3.msra.mxu0 %v466_v51  ;;  %v218_v59 = vmul.f32 %v1684_v7, %v152_v57  ;;  %v480_v7 = vld [vmem:[%s1977_s3 + $0x10] sm:$0xff]  ;;  %v553_v57 = vpop.permute.xlu0 %552 }
 0x12d   :  { %1221 = vmatprep.subr.mxu0 %v465_v26 }
 0x12e   :  { %1222 = vmatpush3.msra.mxu0 %v465_v26  ;;  %v234_v3 = vadd.f32 %v218_v59, %v134_v62 }
 0x12f   :  { %1223 = vmatprep.subr.mxu0 %v464_v52 }
 0x130   :  { %v256_v58 = vpop.permute.xlu1 %255  ;;  %1224 = vmatpush3.msra.mxu0 %v464_v52 }
 0x131   :  { %v319_v0 = vmul.f32 %v1692_v10, %v256_v58 }
 0x133   :  { %v335_v14 = vadd.f32 %v319_v0, %v235_v8  ;;  %v543_v0 = vpop.permute.xlu0 %542 }
 0x134   :  { %v252_v4 = vpop.permute.xlu1 %251 }
 0x135   :  { %v318_v6 = vmul.f32 %v1692_v10, %v252_v4  ;;  %v482_v10 = vld [vmem:[%s1977_s3 + $0x20] sm:$0xff] }
 0x137   :  { %v334_v13 = vadd.f32 %v318_v6, %v234_v3 }
 0x139   :  { %v374_v16 = vpop.permute.xlu1 %373  ;;  %v446_v17 = vadd.f32 %v369_v15, %v334_v13 }
 0x13a   :  { %v447_v11 = vadd.f32 %v374_v16, %v335_v14  ;;  %v533_v16 = vpop.permute.xlu0 %532 }
 0x13b   :  { %v462_v19 = vmax.f32 %v446_v17, 0.0 }
 0x13c   :  { %v463_v18 = vmax.f32 %v447_v11, 0.0 }
 0x13d   :  { %v588_v38 = vpop.permute.xlu1 %587 }
 0x13e   :  { %1225 = vmatprep.subr.mxu0 %v463_v18 }
 0x13f   :  { %1226 = vmatpush3.msra.mxu0 %v463_v18 }
 0x140   :  { %1227 = vmatprep.subr.mxu0 %v462_v19 }
 0x141   :  { %1228 = vmatpush3.msra.mxu0 %v462_v19  ;;  %v578_v43 = vpop.permute.xlu1 %577 }
 0x142   :  { %1230 = vmatmul.mubr.f32.vlgmr.msra.gmra.mxu0 %v479_v1 }
 0x143   :  { %1232 = vmatprep.mubr.f32.mxu0 %v480_v7 }
 0x145   :  { %v568_v49 = vpop.permute.xlu1 %567 }
 0x146   :  { %1233 = vmatmul.mubr.f32.gmra.mxu0 %v481_v9 }
 0x147   :  { %1235 = vmatprep.mubr.f32.mxu0 %v482_v10  ;;  %v523_v10 = vpop.permute.xlu0 %522 }
 0x149   :  { %v558_v12 = vpop.permute.xlu1 %557 }
 0x14a   :  { %1236 = vmatmul.mubr.f32.gmra.mxu0 %v483_v20 }
 0x14b   :  { %1238 = vmatprep.mubr.f32.mxu0 %v484_v21 }
 0x14d   :  { %v548_v61 = vpop.permute.xlu1 %547 }
 0x14e   :  { %1239 = vmatmul.mubr.f32.gmra.mxu0 %v485_v22 }
 0x14f   :  { %1241 = vmatprep.mubr.f32.mxu0 %v486_v23 }
 0x151   :  { %v538_v13 = vpop.permute.xlu1 %537 }
 0x152   :  { %1242 = vmatmul.mubr.f32.gmra.mxu0 %v487_v27 }
 0x153   :  { %1244 = vmatprep.mubr.f32.mxu0 %v488_v28 }
 0x155   :  { %v528_v1 = vpop.permute.xlu1 %527 }
 0x156   :  { %1245 = vmatmul.mubr.f32.gmra.mxu0 %v489_v48 }
 0x157   :  { %1247 = vmatprep.mubr.f32.mxu0 %v490_v29  ;;  %v513_v29 = vpop.permute.xlu0 %512 }
 0x159   :  { %v518_v27 = vpop.permute.xlu1 %517 }
 0x15a   :  { %1248 = vmatmul.mubr.f32.gmra.mxu0 %v491_v30 }
 0x15b   :  { %1250 = vmatprep.mubr.f32.mxu0 %v492_v31 }
 0x15e   :  { %1251 = vmatmul.mubr.f32.gmra.mxu0 %v493_v56 }
 0x202   :  { %v1882_v25 = vpop.f32.mrf.mxu0 }
 0x203   :  { %v662_v28 = vadd.f32 %v1882_v25, %v518_v27  ;;  %v753_v25 = vld [vmem:[%s1979_s5 + $0x10] sm:$0xff] }
 0x204   :  { %v1884_v33 = vpop.f32.mrf.mxu0 }
 0x205   :  { %v657_v30 = vadd.f32 %v1884_v33, %v513_v29  ;;  %v736_v56 = vmax.f32 %v662_v28, 0.0  ;;  %v754_v33 = vld [vmem:[%s1979_s5 + $0x18] sm:$0xff] }
 0x206   :  { %v1886_v34 = vpop.f32.mrf.mxu0 }
 0x207   :  { %v672_v20 = vadd.f32 %v1886_v34, %v528_v1  ;;  %v735_v32 = vmax.f32 %v657_v30, 0.0  ;;  %v752_v34 = vld [vmem:[%s1979_s5 + $0x8] sm:$0xff] }
 0x208   :  { %v1888_v35 = vpop.f32.mrf.mxu0 }
 0x209   :  { %v667_v22 = vadd.f32 %v1888_v35, %v523_v10  ;;  %v738_v48 = vmax.f32 %v672_v20, 0.0  ;;  %v755_v35 = vld [vmem:[%s1979_s5 + $0x20] sm:$0xff] }
 0x20a   :  { %v1237_v36 = vpop.f32.mrf.mxu0 }
 0x20b   :  { %v682_v18 = vadd.f32 %v1237_v36, %v538_v13  ;;  %v737_v31 = vmax.f32 %v667_v22, 0.0  ;;  %v756_v36 = vld [vmem:[%s1979_s5 + $0x28] sm:$0xff] }
 0x20c   :  { %v676_v37 = vpop.f32.mrf.mxu0 }
 0x20d   :  { %v677_v7 = vadd.f32 %v676_v37, %v533_v16  ;;  %v740_v21 = vmax.f32 %v682_v18, 0.0  ;;  %v757_v37 = vld [vmem:[%s1979_s5 + $0x30] sm:$0xff] }
 0x20e   :  { %v1240_v24 = vpop.f32.mrf.mxu0 }
 0x20f   :  { %v692_v14 = vadd.f32 %v1240_v24, %v548_v61  ;;  %v739_v23 = vmax.f32 %v677_v7, 0.0  ;;  %v759_v24 = vld [vmem:[%s1979_s5 + $0x40] sm:$0xff] }
 0x210   :  { %v686_v41 = vpop.f32.mrf.mxu0 }
 0x211   :  { %v687_v11 = vadd.f32 %v686_v41, %v543_v0  ;;  %v742_v19 = vmax.f32 %v692_v14, 0.0  ;;  %v761_v41 = vld [vmem:[%s1979_s5 + $0x50] sm:$0xff] }
 0x212   :  { %v1243_v42 = vpop.f32.mrf.mxu0 }
 0x213   :  { %v702_v4 = vadd.f32 %v1243_v42, %v558_v12  ;;  %v741_v9 = vmax.f32 %v687_v11, 0.0  ;;  %v762_v42 = vld [vmem:[%s1979_s5 + $0x58] sm:$0xff]  ;;  %v861_v12 = vpop.permute.xlu1 %860 }
 0x214   :  { %v696_v44 = vpop.f32.mrf.mxu0 }
 0x215   :  { %v697_v6 = vadd.f32 %v696_v44, %v553_v57  ;;  %v744_v15 = vmax.f32 %v702_v4, 0.0  ;;  %v764_v44 = vld [vmem:[%s1979_s5 + $0x68] sm:$0xff] }
 0x216   :  { %v1246_v46 = vpop.f32.mrf.mxu0 }
 0x217   :  { %v712_v58 = vadd.f32 %v1246_v46, %v568_v49  ;;  %v743_v17 = vmax.f32 %v697_v6, 0.0  ;;  %v766_v46 = vld [vmem:[%s1979_s5 + $0x78] sm:$0xff]  ;;  %v851_v57 = vpop.permute.xlu1 %850 }
 0x218   :  { %v706_v47 = vpop.f32.mrf.mxu0 }
 0x219   :  { %v707_v62 = vadd.f32 %v706_v47, %v563_v60  ;;  %v746_v3 = vmax.f32 %v712_v58, 0.0  ;;  %v1415_v47 = vmov 0.0  }
 0x21a   :  { %v1249_v50 = vpop.f32.mrf.mxu0  ;;  %1309 = vmatprep.subr.mxu0 %v1415_v47  ;;  %1341 = vmatprep.mubr.msk.f32.mxu0 %vm1416_vm0, %v1415_v47 }
 0x21b   :  { %v722_v55 = vadd.f32 %v1249_v50, %v578_v43  ;;  %v745_v8 = vmax.f32 %v707_v62, 0.0  ;;  %v763_v43 = vld [vmem:[%s1979_s5 + $0x60] sm:$0xff]  ;;  %v841_v61 = vpop.permute.xlu1 %840 }
 0x21c   :  { %v716_v5 = vpop.f32.mrf.mxu0 }
 0x21d   :  { %v717_v26 = vadd.f32 %v716_v5, %v573_v39  ;;  %v748_v59 = vmax.f32 %v722_v55, 0.0  ;;  %v765_v39 = vld [vmem:[%s1979_s5 + $0x70] sm:$0xff]  ;;  %v856_v55 = vpop.permute.xlu0 %855 }
 0x21e   :  { %v1252_v53 = vpop.f32.mrf.mxu0 }
 0x21f   :  { %v732_v2 = vadd.f32 %v1252_v53, %v588_v38  ;;  %v747_v63 = vmax.f32 %v717_v26, 0.0  ;;  %v758_v38 = vld [vmem:[%s1979_s5 + $0x38] sm:$0xff]  ;;  %v831_v6 = vpop.permute.xlu1 %830 }
 0x220   :  { %v726_v54 = vpop.f32.mrf.mxu0 }
 0x221   :  { %v750_v51 = vmax.f32 %v732_v2, 0.0  ;;  %v727_v45 = vadd.f32 %v726_v54, %v583_v40  ;;  %v760_v40 = vld [vmem:[%s1979_s5 + $0x48] sm:$0xff] }
 0x223   :  { %v749_v52 = vmax.f32 %v727_v45, 0.0  ;;  %1253 = vmatprep.subr.mxu1 %v750_v51  ;;  %v821_v1 = vpop.permute.xlu1 %820 }
 0x224   :  { %1254 = vmatpush3.msra.mxu1 %v750_v51 }
 0x225   :  { %1255 = vmatprep.subr.mxu1 %v749_v52 }
 0x226   :  { %1256 = vmatpush3.msra.mxu1 %v749_v52  ;;  %v846_v52 = vpop.permute.xlu0 %845 }
 0x227   :  { %1257 = vmatprep.subr.mxu1 %v748_v59  ;;  %v811_v27 = vpop.permute.xlu1 %810 }
 0x228   :  { %1258 = vmatpush3.msra.mxu1 %v748_v59 }
 0x229   :  { %1259 = vmatprep.subr.mxu1 %v747_v63 }
 0x22a   :  { %1260 = vmatpush3.msra.mxu1 %v747_v63  ;;  %v836_v63 = vpop.permute.xlu0 %835 }
 0x22b   :  { %1261 = vmatprep.subr.mxu1 %v746_v3 }
 0x22c   :  { %1262 = vmatpush3.msra.mxu1 %v746_v3 }
 0x22d   :  { %1263 = vmatprep.subr.mxu1 %v745_v8 }
 0x22e   :  { %1264 = vmatpush3.msra.mxu1 %v745_v8  ;;  %v826_v16 = vpop.permute.xlu0 %825 }
 0x22f   :  { %1265 = vmatprep.subr.mxu1 %v744_v15 }
 0x230   :  { %1266 = vmatpush3.msra.mxu1 %v744_v15 }
 0x231   :  { %1267 = vmatprep.subr.mxu1 %v743_v17 }
 0x232   :  { %1268 = vmatpush3.msra.mxu1 %v743_v17  ;;  %v816_v10 = vpop.permute.xlu0 %815 }
 0x233   :  { %1269 = vmatprep.subr.mxu1 %v742_v19 }
 0x234   :  { %1270 = vmatpush3.msra.mxu1 %v742_v19 }
 0x235   :  { %1271 = vmatprep.subr.mxu1 %v741_v9 }
 0x236   :  { %1272 = vmatpush3.msra.mxu1 %v741_v9  ;;  %v806_v29 = vpop.permute.xlu0 %805 }
 0x237   :  { %1273 = vmatprep.subr.mxu1 %v740_v21 }
 0x238   :  { %1274 = vmatpush3.msra.mxu1 %v740_v21 }
 0x239   :  { %1275 = vmatprep.subr.mxu1 %v739_v23 }
 0x23a   :  { %1276 = vmatpush3.msra.mxu1 %v739_v23 }
 0x23b   :  { %1277 = vmatprep.subr.mxu1 %v738_v48 }
 0x23c   :  { %1278 = vmatpush3.msra.mxu1 %v738_v48 }
 0x23d   :  { %1279 = vmatprep.subr.mxu1 %v737_v31 }
 0x23e   :  { %1280 = vmatpush3.msra.mxu1 %v737_v31 }
 0x23f   :  { %1281 = vmatprep.subr.mxu1 %v736_v56 }
 0x240   :  { %1282 = vmatpush3.msra.mxu1 %v736_v56 }
 0x241   :  { %1283 = vmatprep.subr.mxu1 %v735_v32 }
 0x242   :  { %1284 = vmatpush3.msra.mxu1 %v735_v32 }
 0x243   :  { %1286 = vmatmul.mubr.f32.vlgmr.msra.gmra.mxu1 %v752_v34  ;;  %v801_v34 = vpop.permute.xlu1 %800 }
 0x244   :  { %1288 = vmatprep.mubr.f32.mxu1 %v753_v25 }
 0x247   :  { %1289 = vmatmul.mubr.f32.gmra.mxu1 %v754_v33 }
 0x248   :  { %1291 = vmatprep.mubr.f32.mxu1 %v755_v35  ;;  %v796_v35 = vpop.permute.xlu0 %795 }
 0x24b   :  { %1292 = vmatmul.mubr.f32.gmra.mxu1 %v756_v36 }
 0x24c   :  { %1294 = vmatprep.mubr.f32.mxu1 %v757_v37 }
 0x24f   :  { %1295 = vmatmul.mubr.f32.gmra.mxu1 %v758_v38 }
 0x250   :  { %1297 = vmatprep.mubr.f32.mxu1 %v759_v24 }
 0x253   :  { %1298 = vmatmul.mubr.f32.gmra.mxu1 %v760_v40  ;;  %v791_v40 = vpop.permute.xlu1 %790 }
 0x254   :  { %1300 = vmatprep.mubr.f32.mxu1 %v761_v41 }
 0x257   :  { %1301 = vmatmul.mubr.f32.gmra.mxu1 %v762_v42 }
 0x258   :  { %1303 = vmatprep.mubr.f32.mxu1 %v763_v43  ;;  %v786_v43 = vpop.permute.xlu0 %785 }
 0x25b   :  { %1304 = vmatmul.mubr.f32.gmra.mxu1 %v764_v44 }
 0x25c   :  { %1306 = vmatprep.mubr.f32.mxu1 %v765_v39 }
 0x25f   :  { %1307 = vmatmul.mubr.f32.gmra.mxu1 %v766_v46 }
 0x303   :  { %v1941_v49 = vpop.f32.mrf.mxu1 }
 0x304   :  { %v935_v41 = vadd.f32 %v1941_v49, %v791_v40  ;;  %v1024_v49 = vld [vmem:[%s1981_s7] sm:$0xff] }
 0x305   :  { %v1943_v50 = vpop.f32.mrf.mxu1 }
 0x306   :  { %v930_v44 = vadd.f32 %v1943_v50, %v786_v43  ;;  %v1009_v46 = vmax.f32 %v935_v41, 0.0  ;;  %v1029_v50 = vpop.permute.xlu1 %1028 }
 0x307   :  { %v1945_v60 = vpop.f32.mrf.mxu1 }
 0x308   :  { %v945_v36 = vadd.f32 %v1945_v60, %v801_v34  ;;  %v1008_v60 = vmax.f32 %v930_v44, 0.0 }
 0x309   :  { %v1947_v5 = vpop.f32.mrf.mxu1 }
 0x30a   :  { %v940_v38 = vadd.f32 %v1947_v5, %v796_v35  ;;  %v1011_v42 = vmax.f32 %v945_v36, 0.0 }
 0x30b   :  { %v1293_v53 = vpop.f32.mrf.mxu1 }
 0x30c   :  { %v955_v56 = vadd.f32 %v1293_v53, %v811_v27  ;;  %v1010_v39 = vmax.f32 %v940_v38, 0.0 }
 0x30d   :  { %v949_v2 = vpop.f32.mrf.mxu1 }
 0x30e   :  { %v950_v25 = vadd.f32 %v949_v2, %v806_v29  ;;  %v1013_v37 = vmax.f32 %v955_v56, 0.0 }
 0x30f   :  { %v1296_v54 = vpop.f32.mrf.mxu1 }
 0x310   :  { %v965_v28 = vadd.f32 %v1296_v54, %v821_v1  ;;  %v1012_v24 = vmax.f32 %v950_v25, 0.0 }
 0x311   :  { %v959_v51 = vpop.f32.mrf.mxu1 }
 0x312   :  { %v960_v30 = vadd.f32 %v959_v51, %v816_v10  ;;  %v1015_v32 = vmax.f32 %v965_v28, 0.0 }
 0x313   :  { %v1299_v45 = vpop.f32.mrf.mxu1 }
 0x314   :  { %v975_v20 = vadd.f32 %v1299_v45, %v831_v6  ;;  %v1014_v33 = vmax.f32 %v960_v30, 0.0 }
 0x315   :  { %v969_v26 = vpop.f32.mrf.mxu1 }
 0x316   :  { %v970_v22 = vadd.f32 %v969_v26, %v826_v16  ;;  %v1017_v48 = vmax.f32 %v975_v20, 0.0 }
 0x317   :  { %v1302_v58 = vpop.f32.mrf.mxu1 }
 0x318   :  { %v985_v18 = vadd.f32 %v1302_v58, %v841_v61  ;;  %v1016_v31 = vmax.f32 %v970_v22, 0.0 }
 0x319   :  { %v979_v59 = vpop.f32.mrf.mxu1 }
 0x31a   :  { %v980_v7 = vadd.f32 %v979_v59, %v836_v63  ;;  %v1019_v21 = vmax.f32 %v985_v18, 0.0 }
 0x31b   :  { %v1305_v62 = vpop.f32.mrf.mxu1 }
 0x31c   :  { %v995_v13 = vadd.f32 %v1305_v62, %v851_v57  ;;  %v1018_v23 = vmax.f32 %v980_v7, 0.0 }
 0x31d   :  { %v989_v0 = vpop.f32.mrf.mxu1 }
 0x31e   :  { %v990_v11 = vadd.f32 %v989_v0, %v846_v52  ;;  %v1021_v19 = vmax.f32 %v995_v13, 0.0 }
 0x31f   :  { %v1308_v4 = vpop.f32.mrf.mxu1 }
 0x320   :  { %v1005_v3 = vadd.f32 %v1308_v4, %v861_v12  ;;  %v1020_v9 = vmax.f32 %v990_v11, 0.0 }
 0x321   :  { %v999_v8 = vpop.f32.mrf.mxu1 }
 0x322   :  { %v1023_v14 = vmax.f32 %v1005_v3, 0.0  ;;  %v1000_v15 = vadd.f32 %v999_v8, %v856_v55 }
 0x324   :  { %v1022_v17 = vmax.f32 %v1000_v15, 0.0  ;;  %1310 = vmatpush3.msra.mxu0 %v1023_v14 }
 0x325   :  { %1311 = vmatprep.subr.mxu0 %v1415_v47 }
 0x326   :  { %1312 = vmatpush3.msra.mxu0 %v1022_v17 }
 0x327   :  { %1313 = vmatprep.subr.mxu0 %v1415_v47 }
 0x328   :  { %1314 = vmatpush3.msra.mxu0 %v1021_v19 }
 0x329   :  { %1315 = vmatprep.subr.mxu0 %v1415_v47 }
 0x32a   :  { %1316 = vmatpush3.msra.mxu0 %v1020_v9 }
 0x32b   :  { %1317 = vmatprep.subr.mxu0 %v1415_v47 }
 0x32c   :  { %1318 = vmatpush3.msra.mxu0 %v1019_v21 }
 0x32d   :  { %1319 = vmatprep.subr.mxu0 %v1415_v47 }
 0x32e   :  { %1320 = vmatpush3.msra.mxu0 %v1018_v23 }
 0x32f   :  { %1321 = vmatprep.subr.mxu0 %v1415_v47 }
 0x330   :  { %1322 = vmatpush3.msra.mxu0 %v1017_v48 }
 0x331   :  { %1323 = vmatprep.subr.mxu0 %v1415_v47 }
 0x332   :  { %1324 = vmatpush3.msra.mxu0 %v1016_v31 }
 0x333   :  { %1325 = vmatprep.subr.mxu0 %v1415_v47 }
 0x334   :  { %1326 = vmatpush3.msra.mxu0 %v1015_v32 }
 0x335   :  { %1327 = vmatprep.subr.mxu0 %v1415_v47 }
 0x336   :  { %1328 = vmatpush3.msra.mxu0 %v1014_v33 }
 0x337   :  { %1329 = vmatprep.subr.mxu0 %v1415_v47 }
 0x338   :  { %1330 = vmatpush3.msra.mxu0 %v1013_v37 }
 0x339   :  { %1331 = vmatprep.subr.mxu0 %v1415_v47 }
 0x33a   :  { %1332 = vmatpush3.msra.mxu0 %v1012_v24 }
 0x33b   :  { %1333 = vmatprep.subr.mxu0 %v1415_v47 }
 0x33c   :  { %1334 = vmatpush3.msra.mxu0 %v1011_v42 }
 0x33d   :  { %1335 = vmatprep.subr.mxu0 %v1415_v47 }
 0x33e   :  { %1336 = vmatpush3.msra.mxu0 %v1010_v39 }
 0x33f   :  { %1337 = vmatprep.subr.mxu0 %v1415_v47 }
 0x340   :  { %1338 = vmatpush3.msra.mxu0 %v1009_v46 }
 0x341   :  { %1339 = vmatprep.subr.mxu0 %v1415_v47 }
 0x342   :  { %1340 = vmatpush3.msra.mxu0 %v1008_v60 }
 0x343   :  { %1342 = vmatmul.mubr.f32.vlgmr.msra.gmra.mxu0 %v1024_v49 }
 0x403   :  { %v1097_v5 = vpop.f32.mrf.mxu0 }
 0x404   :  { %v1098_v53 = vadd.f32 %v1097_v5, %v1029_v50 }
 0x405   :  { %v1343_v2 = vpop.f32.mrf.mxu0 }
 0x406   :  { %1101 = vst [vmem:[#allocation2] sm:$0xff] %v1098_v53 }
 0x407   :  { %1401 = shalt.err (!%p1398_p4)
}
 0x408   :  { %1111 = dma.vmem_to_hbm [thread:$0]  %s1109_s14, 128, %s1983_s9, [#allocation3]  }
 0x409   :  { %1410 = dma.done.wait [#allocation3], 128  }
 0x40a   :  { %1411 = vsyncadd [#allocation3], 4294967168 }
 0x40b   :  { %1115 = vsyncpa [#allocation3], 1 }

</bundles_post_ra>
